<compile_context>
chip_gen: v6e
topology: v6e:2x2x1
jax: 0.10.0
libtpu: 0.0.40
codegen_flags: <defaults>
</compile_context>

<pallas_src>
import math
from functools import partial

import jax
import jax.numpy as jnp
from jax.experimental import pallas as pl
from jax.experimental.pallas import tpu as pltpu

RHO = 0.05            # sparsity target
EPS = 1e-7
LANE = 128
# Hoisted constant part of KL(rho || rho_hat): rho*log(rho) + (1-rho)*log(1-rho)
_KL_CONST = RHO * math.log(RHO) + (1.0 - RHO) * math.log(1.0 - RHO)


def _round_up(x, m):
    return (x + m - 1) // m * m


def _pad2d(a, rows, cols):
    """Zero-pad a 2-D array up to (rows, cols); no-op copy avoided if aligned."""
    r, c = a.shape
    if r == rows and c == cols:
        return a
    return jnp.pad(a, ((0, rows - r), (0, cols - c)))


def _per_column_kl(col_sum, batch_n, n_valid):
    """Per-hidden-unit KL(rho || rho_hat), zeroed on padded columns.

    col_sum: (1, Dpad) f32 column-wise activation sums over the (valid) batch.
    KL_j = const - rho*log(rho_hat_j) - (1-rho)*log(1-rho_hat_j)
    """
    rho_hat = jnp.clip(col_sum * (1.0 / batch_n), EPS, 1.0 - EPS)
    t = (_KL_CONST
         - RHO * jnp.log(rho_hat)
         - (1.0 - RHO) * jnp.log(1.0 - rho_hat))
    col = jax.lax.broadcasted_iota(jnp.int32, col_sum.shape, 1)
    return jnp.where(col < n_valid, t, 0.0)


def _fused_sparse_nn_kernel(x_ref, w1_ref, b1_ref, w2_ref, b2_ref,
                            x2_ref, klv1_ref, klv2_ref,
                            sum1_ref, sum2_ref,
                            *, tb, b_valid, hid_valid, out_valid, mask_rows):
    i = pl.program_id(0)
    nb = pl.num_programs(0)

    @pl.when(i == 0)
    def _init():
        sum1_ref[...] = jnp.zeros_like(sum1_ref)
        sum2_ref[...] = jnp.zeros_like(sum2_ref)

    # ---- encoder: sigmoid(x @ W1 + b1) ------------------------------------
    # Native-dtype MXU operands, f32 accumulation.
    z1 = jnp.dot(x_ref[...], w1_ref[...], preferred_element_type=jnp.float32)
    a1 = jax.nn.sigmoid(z1 + b1_ref[...].astype(jnp.float32))      # (tb, HIDp) f32

    # ---- predictor: sigmoid(a1 @ W2 + b2); a1 never touches HBM ------------
    z2 = jnp.dot(a1.astype(w2_ref.dtype), w2_ref[...],
                 preferred_element_type=jnp.float32)
    a2 = jax.nn.sigmoid(z2 + b2_ref[...].astype(jnp.float32))      # (tb, OUTp) f32
    x2_ref[...] = a2.astype(x2_ref.dtype)

    # ---- accumulate per-unit activation sums for rho_hat -------------------
    if mask_rows:  # only needed when the batch was padded up to the tile size
        row = jax.lax.broadcasted_iota(jnp.int32, (tb, 1), 0) + i * tb
        rmask = (row < b_valid).astype(jnp.float32)
        a1 = a1 * rmask
        a2 = a2 * rmask
    sum1_ref[...] += jnp.sum(a1, axis=0, keepdims=True)
    sum2_ref[...] += jnp.sum(a2, axis=0, keepdims=True)

    # ---- finalize: lane-dense per-unit KL vectors (constants hoisted) ------
    @pl.when(i == nb - 1)
    def _finalize():
        klv1_ref[...] = _per_column_kl(sum1_ref[...], b_valid, hid_valid)
        klv2_ref[...] = _per_column_kl(sum2_ref[...], b_valid, out_valid)


def sparse_nn_forward(x, params):
    """Mirrors SparseNN.forward: returns (x2, kl1, kl2)."""
    w1, b1 = params["enc_w"], params["enc_b"]
    w2, b2 = params["pred_w"], params["pred_b"]
    B, IN = x.shape
    HID = w1.shape[1]
    OUT = w2.shape[1]

    # Pad feature dims to the 128-lane vreg width (lane-dense MXU / stores) and
    # the batch up to a sublane-aligned batch tile.
    INp, HIDp, OUTp = (_round_up(d, LANE) for d in (IN, HID, OUT))
    Bp = _round_up(B, 8)
    tb = min(Bp, 512)          # biggest tile that keeps the working set tiny
    Bp = _round_up(Bp, tb)
    nb = Bp // tb

    xp = _pad2d(x, Bp, INp)
    w1p = _pad2d(w1, INp, HIDp)
    b1p = _pad2d(b1, 1, HIDp)
    w2p = _pad2d(w2, HIDp, OUTp)
    b2p = _pad2d(b2, 1, OUTp)

    kernel = partial(_fused_sparse_nn_kernel,
                     tb=tb, b_valid=B, hid_valid=HID, out_valid=OUT,
                     mask_rows=(Bp != B))

    x2p, klv1, klv2 = pl.pallas_call(
        kernel,
        out_shape=(
            jax.ShapeDtypeStruct((Bp, OUTp), x.dtype),
            jax.ShapeDtypeStruct((1, HIDp), jnp.float32),
            jax.ShapeDtypeStruct((1, OUTp), jnp.float32),
        ),
        grid_spec=pltpu.PrefetchScalarGridSpec(
            num_scalar_prefetch=0,
            grid=(nb,),
            in_specs=[
                pl.BlockSpec((tb, INp), lambda i: (i, 0)),     # x tile
                pl.BlockSpec((INp, HIDp), lambda i: (0, 0)),   # W1 (resident)
                pl.BlockSpec((1, HIDp), lambda i: (0, 0)),     # b1
                pl.BlockSpec((HIDp, OUTp), lambda i: (0, 0)),  # W2 (resident)
                pl.BlockSpec((1, OUTp), lambda i: (0, 0)),     # b2
            ],
            out_specs=[
                pl.BlockSpec((tb, OUTp), lambda i: (i, 0)),    # x2 tile
                pl.BlockSpec((1, HIDp), lambda i: (0, 0)),     # per-unit KL, layer 1
                pl.BlockSpec((1, OUTp), lambda i: (0, 0)),     # per-unit KL, layer 2
            ],
            scratch_shapes=[
                pltpu.VMEM((1, HIDp), jnp.float32),            # sum of a1 over batch
                pltpu.VMEM((1, OUTp), jnp.float32),            # sum of a2 over batch
            ],
        ),
        compiler_params=pltpu.CompilerParams(
            # Batch axis carries the rho_hat accumulation -> reduction axis.
            dimension_semantics=("arbitrary",)),
    )(xp, w1p, b1p, w2p, b2p)

    x2 = x2p[:B, :OUT]
    kl1 = jnp.sum(klv1)
    kl2 = jnp.sum(klv2)
    return x2, kl1, kl2


def init_params(key, in_dim, hid_dim, out_dim, dtype=jnp.float32):
    k1, k2 = jax.random.split(key)
    enc_w = jax.random.normal(k1, (in_dim, hid_dim), dtype) * 0.1
    enc_b = jnp.zeros((1, hid_dim), dtype)
    pred_w = jax.random.normal(k2, (hid_dim, out_dim), dtype) * 0.1
    pred_b = jnp.zeros((1, out_dim), dtype)
    return {"enc_w": enc_w, "enc_b": enc_b, "pred_w": pred_w, "pred_b": pred_b}


if __name__ == "__main__":
    B, IN, HID, OUT = 8, 32, 32, 16

    key = jax.random.PRNGKey(0)
    kx, kp = jax.random.split(key)
    x = jax.random.normal(kx, (B, IN), jnp.float32)
    params = init_params(kp, IN, HID, OUT)

    x2, kl1, kl2 = jax.jit(sparse_nn_forward)(x, params)
    jax.block_until_ready((x2, kl1, kl2))

    # pure-JAX reference
    def ref_layer(x, w, b):
        a = jax.nn.sigmoid(x @ w + b)
        rho_hat = jnp.clip(jnp.mean(a, axis=0), EPS, 1.0 - EPS)
        kl = jnp.sum(RHO * jnp.log(RHO / rho_hat)
                     + (1.0 - RHO) * jnp.log((1.0 - RHO) / (1.0 - rho_hat)))
        return a, kl

    r1, rkl1 = ref_layer(x, params["enc_w"], params["enc_b"])
    r2, rkl2 = ref_layer(r1, params["pred_w"], params["pred_b"])
    assert jnp.allclose(x2, r2, atol=1e-5), "activation mismatch"
    assert jnp.allclose(kl1, rkl1, atol=1e-4), "kl1 mismatch"
    assert jnp.allclose(kl2, rkl2, atol=1e-4), "kl2 mismatch"

    print("KERNEL_OK")
</pallas_src>

<mosaic_0001>
module attributes {stable_mosaic.version = 11 : i64} {
  func.func @_fused_sparse_nn_kernel(%arg0: i32, %arg1: memref<8x128xf32, #tpu.memory_space<vmem>>, %arg2: memref<128x128xf32, #tpu.memory_space<vmem>>, %arg3: memref<1x128xf32, #tpu.memory_space<vmem>>, %arg4: memref<128x128xf32, #tpu.memory_space<vmem>>, %arg5: memref<1x128xf32, #tpu.memory_space<vmem>>, %arg6: memref<8x128xf32, #tpu.memory_space<vmem>>, %arg7: memref<1x128xf32, #tpu.memory_space<vmem>>, %arg8: memref<1x128xf32, #tpu.memory_space<vmem>>, %arg9: memref<1x128xf32, #tpu.memory_space<vmem>>, %arg10: memref<1x128xf32, #tpu.memory_space<vmem>>) attributes {dimension_semantics = [#tpu.dimension_semantics<arbitrary>], iteration_bounds = array<i64: 1>, scalar_prefetch = 0 : i64, scratch_operands = 2 : i64, tpu.core_type = #tpu.core_type<tc>, window_params = [{transform_indices = @transform_0, window_bounds = array<i64: 8, 128>}, {pipeline_mode = #tpu.pipeline_mode<synchronous>, transform_indices = @transform_1, window_bounds = array<i64: 128, 128>}, {pipeline_mode = #tpu.pipeline_mode<synchronous>, transform_indices = @transform_2, window_bounds = array<i64: 1, 128>}, {pipeline_mode = #tpu.pipeline_mode<synchronous>, transform_indices = @transform_3, window_bounds = array<i64: 128, 128>}, {pipeline_mode = #tpu.pipeline_mode<synchronous>, transform_indices = @transform_4, window_bounds = array<i64: 1, 128>}, {transform_indices = @transform_5, window_bounds = array<i64: 8, 128>}, {pipeline_mode = #tpu.pipeline_mode<synchronous>, transform_indices = @transform_6, window_bounds = array<i64: 1, 128>}, {pipeline_mode = #tpu.pipeline_mode<synchronous>, transform_indices = @transform_7, window_bounds = array<i64: 1, 128>}]} {
    %c0_i32 = arith.constant 0 : i32
    %0 = arith.cmpi eq, %arg0, %c0_i32 : i32
    %1 = arith.extui %0 : i1 to i32
    %c0_i32_0 = arith.constant 0 : i32
    %2 = arith.cmpi ne, %1, %c0_i32_0 : i32
    scf.if %2 {
      %cst_27 = arith.constant 0.000000e+00 : f32
      %38 = vector.broadcast %cst_27 : f32 to vector<1x128xf32>
      %c0_28 = arith.constant 0 : index
      %c0_29 = arith.constant 0 : index
      %39 = vector.load %arg9[%c0_28, %c0_29] : memref<1x128xf32, #tpu.memory_space<vmem>>, vector<1x128xf32>
      tpu.vector_store %arg9[%c0_28, %c0_29], %38 {strides = array<i32>} : memref<1x128xf32, #tpu.memory_space<vmem>>, vector<1x128xf32>,
      %cst_30 = arith.constant 0.000000e+00 : f32
      %40 = vector.broadcast %cst_30 : f32 to vector<1x128xf32>
      %c0_31 = arith.constant 0 : index
      %c0_32 = arith.constant 0 : index
      %41 = vector.load %arg10[%c0_31, %c0_32] : memref<1x128xf32, #tpu.memory_space<vmem>>, vector<1x128xf32>
      tpu.vector_store %arg10[%c0_31, %c0_32], %40 {strides = array<i32>} : memref<1x128xf32, #tpu.memory_space<vmem>>, vector<1x128xf32>,
    } else {
    }
    %c0 = arith.constant 0 : index
    %c0_1 = arith.constant 0 : index
    %3 = vector.load %arg1[%c0, %c0_1] : memref<8x128xf32, #tpu.memory_space<vmem>>, vector<8x128xf32>
    %c0_2 = arith.constant 0 : index
    %c0_3 = arith.constant 0 : index
    %4 = vector.load %arg2[%c0_2, %c0_3] : memref<128x128xf32, #tpu.memory_space<vmem>>, vector<128x128xf32>
    %cst = arith.constant dense<0.000000e+00> : vector<8x128xf32>
    %5 = tpu.matmul %3, %4, %cst {dimension_numbers = #tpu.dot_dimension_numbers<[1], [0], [0], [1], [0, 0, 1, 1], [], []>} : vector<8x128xf32>, vector<128x128xf32>, vector<8x128xf32> -> vector<8x128xf32>
    %c0_4 = arith.constant 0 : index
    %c0_5 = arith.constant 0 : index
    %6 = vector.load %arg3[%c0_4, %c0_5] : memref<1x128xf32, #tpu.memory_space<vmem>>, vector<1x128xf32>
    %7 = vector.broadcast %6 : vector<1x128xf32> to vector<8x128xf32>
    %8 = arith.addf %5, %7 : vector<8x128xf32>
    %9 = arith.negf %8 : vector<8x128xf32>
    %10 = math.exp %9 : vector<8x128xf32>
    %cst_6 = arith.constant 1.000000e+00 : f32
    %11 = vector.broadcast %cst_6 : f32 to vector<8x128xf32>
    %12 = arith.addf %11, %10 : vector<8x128xf32>
    %13 = arith.divf %11, %12 : vector<8x128xf32>
    %c0_7 = arith.constant 0 : index
    %c0_8 = arith.constant 0 : index
    %14 = vector.load %arg4[%c0_7, %c0_8] : memref<128x128xf32, #tpu.memory_space<vmem>>, vector<128x128xf32>
    %cst_9 = arith.constant dense<0.000000e+00> : vector<8x128xf32>
    %15 = tpu.matmul %13, %14, %cst_9 {dimension_numbers = #tpu.dot_dimension_numbers<[1], [0], [0], [1], [0, 0, 1, 1], [], []>} : vector<8x128xf32>, vector<128x128xf32>, vector<8x128xf32> -> vector<8x128xf32>
    %c0_10 = arith.constant 0 : index
    %c0_11 = arith.constant 0 : index
    %16 = vector.load %arg5[%c0_10, %c0_11] : memref<1x128xf32, #tpu.memory_space<vmem>>, vector<1x128xf32>
    %17 = vector.broadcast %16 : vector<1x128xf32> to vector<8x128xf32>
    %18 = arith.addf %15, %17 : vector<8x128xf32>
    %19 = arith.negf %18 : vector<8x128xf32>
    %20 = math.exp %19 : vector<8x128xf32>
    %cst_12 = arith.constant 1.000000e+00 : f32
    %21 = vector.broadcast %cst_12 : f32 to vector<8x128xf32>
    %22 = arith.addf %21, %20 : vector<8x128xf32>
    %23 = arith.divf %21, %22 : vector<8x128xf32>
    %c0_13 = arith.constant 0 : index
    %c0_14 = arith.constant 0 : index
    %24 = vector.load %arg6[%c0_13, %c0_14] : memref<8x128xf32, #tpu.memory_space<vmem>>, vector<8x128xf32>
    tpu.vector_store %arg6[%c0_13, %c0_14], %23 {strides = array<i32>} : memref<8x128xf32, #tpu.memory_space<vmem>>, vector<8x128xf32>,
    %c0_15 = arith.constant 0 : index
    %c0_16 = arith.constant 0 : index
    %25 = vector.load %arg9[%c0_15, %c0_16] : memref<1x128xf32, #tpu.memory_space<vmem>>, vector<1x128xf32>
    %cst_17 = arith.constant dense<0.000000e+00> : vector<128xf32>
    %26 = vector.multi_reduction <add>, %13, %cst_17 [0] : vector<8x128xf32> to vector<128xf32>
    %27 = vector.shape_cast %26 : vector<128xf32> to vector<1x128xf32>
    %28 = arith.addf %25, %27 : vector<1x128xf32>
    %c0_18 = arith.constant 0 : index
    %c0_19 = arith.constant 0 : index
    %29 = vector.load %arg9[%c0_18, %c0_19] : memref<1x128xf32, #tpu.memory_space<vmem>>, vector<1x128xf32>
    tpu.vector_store %arg9[%c0_18, %c0_19], %28 {strides = array<i32>} : memref<1x128xf32, #tpu.memory_space<vmem>>, vector<1x128xf32>,
    %c0_20 = arith.constant 0 : index
    %c0_21 = arith.constant 0 : index
    %30 = vector.load %arg10[%c0_20, %c0_21] : memref<1x128xf32, #tpu.memory_space<vmem>>, vector<1x128xf32>
    %cst_22 = arith.constant dense<0.000000e+00> : vector<128xf32>
    %31 = vector.multi_reduction <add>, %23, %cst_22 [0] : vector<8x128xf32> to vector<128xf32>
    %32 = vector.shape_cast %31 : vector<128xf32> to vector<1x128xf32>
    %33 = arith.addf %30, %32 : vector<1x128xf32>
    %c0_23 = arith.constant 0 : index
    %c0_24 = arith.constant 0 : index
    %34 = vector.load %arg10[%c0_23, %c0_24] : memref<1x128xf32, #tpu.memory_space<vmem>>, vector<1x128xf32>
    tpu.vector_store %arg10[%c0_23, %c0_24], %33 {strides = array<i32>} : memref<1x128xf32, #tpu.memory_space<vmem>>, vector<1x128xf32>,
    %c0_i32_25 = arith.constant 0 : i32
    %35 = arith.cmpi eq, %arg0, %c0_i32_25 : i32
    %36 = arith.extui %35 : i1 to i32
    %c0_i32_26 = arith.constant 0 : i32
    %37 = arith.cmpi ne, %36, %c0_i32_26 : i32
    scf.if %37 {
      %c0_27 = arith.constant 0 : index
      %c0_28 = arith.constant 0 : index
      %38 = vector.load %arg9[%c0_27, %c0_28] : memref<1x128xf32, #tpu.memory_space<vmem>>, vector<1x128xf32>
      %cst_29 = arith.constant 1.250000e-01 : f32
      %39 = vector.broadcast %cst_29 : f32 to vector<1x128xf32>
      %40 = arith.mulf %38, %39 : vector<1x128xf32>
      %cst_30 = arith.constant 1.000000e-07 : f32
      %cst_31 = arith.constant 0.99999988 : f32
      %41 = vector.broadcast %cst_30 : f32 to vector<1x128xf32>
      %42 = arith.maximumf %41, %40 : vector<1x128xf32>
      %43 = vector.broadcast %cst_31 : f32 to vector<1x128xf32>
      %44 = arith.minimumf %43, %42 : vector<1x128xf32>
      %45 = math.log %44 : vector<1x128xf32>
      %cst_32 = arith.constant 5.000000e-02 : f32
      %46 = vector.broadcast %cst_32 : f32 to vector<1x128xf32>
      %47 = arith.mulf %46, %45 : vector<1x128xf32>
      %cst_33 = arith.constant -0.198515236 : f32
      %48 = vector.broadcast %cst_33 : f32 to vector<1x128xf32>
      %49 = arith.subf %48, %47 : vector<1x128xf32>
      %cst_34 = arith.constant 1.000000e+00 : f32
      %50 = vector.broadcast %cst_34 : f32 to vector<1x128xf32>
      %51 = arith.subf %50, %44 : vector<1x128xf32>
      %52 = math.log %51 : vector<1x128xf32>
      %cst_35 = arith.constant 0.949999988 : f32
      %53 = vector.broadcast %cst_35 : f32 to vector<1x128xf32>
      %54 = arith.mulf %53, %52 : vector<1x128xf32>
      %55 = arith.subf %49, %54 : vector<1x128xf32>
      %56 = tpu.iota {dimensions = array<i32: 1>} : vector<1x128xi32>
      %c32_i32 = arith.constant 32 : i32
      %57 = vector.broadcast %c32_i32 : i32 to vector<1x128xi32>
      %58 = arith.cmpi slt, %56, %57 : vector<1x128xi32>
      %cst_36 = arith.constant 0.000000e+00 : f32
      %59 = vector.broadcast %cst_36 : f32 to vector<1x128xf32>
      %60 = arith.select %58, %55, %59 : vector<1x128xi1>, vector<1x128xf32>
      %c0_37 = arith.constant 0 : index
      %c0_38 = arith.constant 0 : index
      %61 = vector.load %arg7[%c0_37, %c0_38] : memref<1x128xf32, #tpu.memory_space<vmem>>, vector<1x128xf32>
      tpu.vector_store %arg7[%c0_37, %c0_38], %60 {strides = array<i32>} : memref<1x128xf32, #tpu.memory_space<vmem>>, vector<1x128xf32>,
      %c0_39 = arith.constant 0 : index
      %c0_40 = arith.constant 0 : index
      %62 = vector.load %arg10[%c0_39, %c0_40] : memref<1x128xf32, #tpu.memory_space<vmem>>, vector<1x128xf32>
      %cst_41 = arith.constant 1.250000e-01 : f32
      %63 = vector.broadcast %cst_41 : f32 to vector<1x128xf32>
      %64 = arith.mulf %62, %63 : vector<1x128xf32>
      %cst_42 = arith.constant 1.000000e-07 : f32
      %cst_43 = arith.constant 0.99999988 : f32
      %65 = vector.broadcast %cst_42 : f32 to vector<1x128xf32>
      %66 = arith.maximumf %65, %64 : vector<1x128xf32>
      %67 = vector.broadcast %cst_43 : f32 to vector<1x128xf32>
      %68 = arith.minimumf %67, %66 : vector<1x128xf32>
      %69 = math.log %68 : vector<1x128xf32>
      %cst_44 = arith.constant 5.000000e-02 : f32
      %70 = vector.broadcast %cst_44 : f32 to vector<1x128xf32>
      %71 = arith.mulf %70, %69 : vector<1x128xf32>
      %cst_45 = arith.constant -0.198515236 : f32
      %72 = vector.broadcast %cst_45 : f32 to vector<1x128xf32>
      %73 = arith.subf %72, %71 : vector<1x128xf32>
      %cst_46 = arith.constant 1.000000e+00 : f32
      %74 = vector.broadcast %cst_46 : f32 to vector<1x128xf32>
      %75 = arith.subf %74, %68 : vector<1x128xf32>
      %76 = math.log %75 : vector<1x128xf32>
      %cst_47 = arith.constant 0.949999988 : f32
      %77 = vector.broadcast %cst_47 : f32 to vector<1x128xf32>
      %78 = arith.mulf %77, %76 : vector<1x128xf32>
      %79 = arith.subf %73, %78 : vector<1x128xf32>
      %80 = tpu.iota {dimensions = array<i32: 1>} : vector<1x128xi32>
      %c16_i32 = arith.constant 16 : i32
      %81 = vector.broadcast %c16_i32 : i32 to vector<1x128xi32>
      %82 = arith.cmpi slt, %80, %81 : vector<1x128xi32>
      %cst_48 = arith.constant 0.000000e+00 : f32
      %83 = vector.broadcast %cst_48 : f32 to vector<1x128xf32>
      %84 = arith.select %82, %79, %83 : vector<1x128xi1>, vector<1x128xf32>
      %c0_49 = arith.constant 0 : index
      %c0_50 = arith.constant 0 : index
      %85 = vector.load %arg8[%c0_49, %c0_50] : memref<1x128xf32, #tpu.memory_space<vmem>>, vector<1x128xf32>
      tpu.vector_store %arg8[%c0_49, %c0_50], %84 {strides = array<i32>} : memref<1x128xf32, #tpu.memory_space<vmem>>, vector<1x128xf32>,
    } else {
    }
    return
  }
  func.func @transform_0(%arg0: i32) -> (i32, i32) {
    %c0_i32 = arith.constant 0 : i32
    %c0_i32_0 = arith.constant 0 : i32
    return %arg0, %c0_i32 : i32, i32
  }
  func.func @transform_1(%arg0: i32) -> (i32, i32) {
    %c0_i32 = arith.constant 0 : i32
    %c0_i32_0 = arith.constant 0 : i32
    %c0_i32_1 = arith.constant 0 : i32
    return %c0_i32, %c0_i32_0 : i32, i32
  }
  func.func @transform_2(%arg0: i32) -> (i32, i32) {
    %c0_i32 = arith.constant 0 : i32
    %c0_i32_0 = arith.constant 0 : i32
    %c0_i32_1 = arith.constant 0 : i32
    return %c0_i32, %c0_i32_0 : i32, i32
  }
  func.func @transform_3(%arg0: i32) -> (i32, i32) {
    %c0_i32 = arith.constant 0 : i32
    %c0_i32_0 = arith.constant 0 : i32
    %c0_i32_1 = arith.constant 0 : i32
    return %c0_i32, %c0_i32_0 : i32, i32
  }
  func.func @transform_4(%arg0: i32) -> (i32, i32) {
    %c0_i32 = arith.constant 0 : i32
    %c0_i32_0 = arith.constant 0 : i32
    %c0_i32_1 = arith.constant 0 : i32
    return %c0_i32, %c0_i32_0 : i32, i32
  }
  func.func @transform_5(%arg0: i32) -> (i32, i32) {
    %c0_i32 = arith.constant 0 : i32
    %c0_i32_0 = arith.constant 0 : i32
    return %arg0, %c0_i32 : i32, i32
  }
  func.func @transform_6(%arg0: i32) -> (i32, i32) {
    %c0_i32 = arith.constant 0 : i32
    %c0_i32_0 = arith.constant 0 : i32
    %c0_i32_1 = arith.constant 0 : i32
    return %c0_i32, %c0_i32_0 : i32, i32
  }
  func.func @transform_7(%arg0: i32) -> (i32, i32) {
    %c0_i32 = arith.constant 0 : i32
    %c0_i32_0 = arith.constant 0 : i32
    %c0_i32_1 = arith.constant 0 : i32
    return %c0_i32, %c0_i32_0 : i32, i32
  }
}

</mosaic_0001>

<bundles_post_ra>
// kernel: sparse_nn_forward.1
= control target key start
LH: loop header
LB: loop body
LE: loop exit
PB: predicated region body
PF: predicated region fallthrough
CT: control target
= control target key end

     0   :  { %v456_v1 = vmov 0.0   ;;  %vm457_vm0 = vmmov 0   ;;  %s649_s0 = inlined_call_operand.vmem [shape: f32[8,128], index: 0, kind: input, shape index: {}]   ;;  %s650_s1 = inlined_call_operand.vmem [shape: f32[128,128], index: 1, kind: input, shape index: {}]   ;;  %s651_s2 = inlined_call_operand.vmem [shape: f32[1,128], index: 2, kind: input, shape index: {}]   ;;  %s652_s3 = inlined_call_operand.vmem [shape: f32[128,128], index: 3, kind: input, shape index: {}]   ;;  %s653_s4 = inlined_call_operand.vmem [shape: f32[1,128], index: 4, kind: input, shape index: {}]   ;;  %s654_s5 = inlined_call_operand.hbm [shape: f32[8,128], index: 5, kind: output, shape index: {0}]   ;;  %s655_s6 = inlined_call_operand.vmem [shape: f32[1,128], index: 6, kind: output, shape index: {1}]   ;;  %s656_s7 = inlined_call_operand.vmem [shape: f32[1,128], index: 7, kind: output, shape index: {2}]  }
   0x1   :  { %v46_v0 = vld [vmem:[%s650_s1 + $0x78] sm:$0xff]  ;;  %345 = vmatprep.subr.mxu0 %v456_v1  ;;  %28 = vst [vmem:[#allocation2] sm:$0x1] %v456_v1  ;;  %29 = vst [vmem:[#allocation3] sm:$0x1] %v456_v1  ;;  %v45_v2 = vld [vmem:[%s650_s1 + $0x70] sm:$0xff]  ;;  %377 = vmatprep.mubr.msk.f32.mxu0 %vm457_vm0, %v456_v1 }
   0x2   :  { %346 = vmatpush3.msra.mxu0 %v46_v0  ;;  %380 = vmatprep.subr.mxu1 %v456_v1  ;;  %v44_v3 = vld [vmem:[%s650_s1 + $0x68] sm:$0xff]  ;;  %v43_v4 = vld [vmem:[%s650_s1 + $0x60] sm:$0xff] }
   0x3   :  { %347 = vmatprep.subr.mxu0 %v456_v1  ;;  %412 = vmatprep.mubr.msk.f32.mxu1 %vm457_vm0, %v456_v1 }
   0x4   :  { %348 = vmatpush3.msra.mxu0 %v45_v2 }
   0x5   :  { %349 = vmatprep.subr.mxu0 %v456_v1 }
   0x6   :  { %350 = vmatpush3.msra.mxu0 %v44_v3 }
   0x7   :  { %13 = vsyncpa [#allocation5], 0  ;;  %351 = vmatprep.subr.mxu0 %v456_v1  ;;  %v42_v5 = vld [vmem:[%s650_s1 + $0x58] sm:$0xff]  ;;  %v41_v6 = vld [vmem:[%s650_s1 + $0x50] sm:$0xff]  ;;  %v264_v55 = vlaneseq  ;;  %s458_s21 = smov [#allocation4]  }
   0x8   :  { %352 = vmatpush3.msra.mxu0 %v43_v4  ;;  %v40_v7 = vld [vmem:[%s650_s1 + $0x48] sm:$0xff]  ;;  %v39_v8 = vld [vmem:[%s650_s1 + $0x40] sm:$0xff]  ;;  %v38_v9 = vld [vmem:[%s650_s1 + $0x38] sm:$0xff]  ;;  %s291_s22 = sshll.u32 %s458_s21, 4  ;;  %s292_s22 = int_to_ptr.vmem [resolvable:$true] %s291_s22 }
   0x9   :  { %353 = vmatprep.subr.mxu0 %v456_v1  ;;  %v37_v10 = vld [vmem:[%s650_s1 + $0x30] sm:$0xff]  ;;  %v36_v11 = vld [vmem:[%s650_s1 + $0x28] sm:$0xff]  ;;  %v35_v12 = vld [vmem:[%s650_s1 + $0x20] sm:$0xff]  ;;  %v265_v59 = vand.u32 127, %v264_v55  ;;  %s434_s23 = scalar_lea.vmem %s292_s22, 128  ;;  %p439_p1 = scmp.lt.s32.totalorder %s292_s22, %s292_s22 }
   0xa   :  { %354 = vmatpush3.msra.mxu0 %v42_v5  ;;  %v34_v13 = vld [vmem:[%s650_s1 + $0x18] sm:$0xff]  ;;  %v33_v14 = vld [vmem:[%s650_s1 + $0x10] sm:$0xff]  ;;  %v32_v15 = vld [vmem:[%s650_s1 + $0x8] sm:$0xff]  ;;  %p435_p0 = scmp.ne.s32.totalorder %s292_s22, %s434_s23  ;;  %p440_p2 = scmp.lt.s32.totalorder %s434_s23, %s434_s23 }
   0xb   :  { %355 = vmatprep.subr.mxu0 %v456_v1  ;;  %v31_v16 = vld [vmem:[%s650_s1] sm:$0xff]  ;;  %v145_v18 = vld [vmem:[%s652_s3 + $0x78] sm:$0xff]  ;;  %v144_v19 = vld [vmem:[%s652_s3 + $0x70] sm:$0xff]  ;;  %vm266_vm1 = vcmp.lt.s32.totalorder %v265_v59, 32 }
   0xc   :  { %356 = vmatpush3.msra.mxu0 %v41_v6  ;;  %v30_v17 = vld [vmem:[%s649_s0] sm:$0xff]  ;;  %381 = vmatpush3.msra.mxu1 %v145_v18  ;;  %v143_v20 = vld [vmem:[%s652_s3 + $0x68] sm:$0xff]  ;;  %v141_v22 = vld [vmem:[%s652_s3 + $0x58] sm:$0xff]  ;;  %p441_p3 = por %p440_p2, %p439_p1 }
   0xd   :  { %357 = vmatprep.subr.mxu0 %v456_v1  ;;  %382 = vmatprep.subr.mxu1 %v456_v1  ;;  %v142_v21 = vld [vmem:[%s652_s3 + $0x60] sm:$0xff]  ;;  %v140_v23 = vld [vmem:[%s652_s3 + $0x50] sm:$0xff]  ;;  %v139_v24 = vld [vmem:[%s652_s3 + $0x48] sm:$0xff] }
   0xe   :  { %358 = vmatpush3.msra.mxu0 %v40_v7  ;;  %383 = vmatpush3.msra.mxu1 %v144_v19  ;;  %v138_v25 = vld [vmem:[%s652_s3 + $0x40] sm:$0xff]  ;;  %v137_v26 = vld [vmem:[%s652_s3 + $0x38] sm:$0xff]  ;;  %v136_v27 = vld [vmem:[%s652_s3 + $0x30] sm:$0xff]  ;;  %p442_p4 = pnand %p441_p3, %p435_p0 }
   0xf   :  { %359 = vmatprep.subr.mxu0 %v456_v1  ;;  %384 = vmatprep.subr.mxu1 %v456_v1  ;;  %v135_v28 = vld [vmem:[%s652_s3 + $0x28] sm:$0xff]  ;;  %v134_v29 = vld [vmem:[%s652_s3 + $0x20] sm:$0xff]  ;;  %v133_v30 = vld [vmem:[%s652_s3 + $0x18] sm:$0xff] }
  0x10   :  { %360 = vmatpush3.msra.mxu0 %v39_v8  ;;  %385 = vmatpush3.msra.mxu1 %v143_v20  ;;  %v132_v31 = vld [vmem:[%s652_s3 + $0x10] sm:$0xff]  ;;  %v131_v32 = vld [vmem:[%s652_s3 + $0x8] sm:$0xff]  ;;  %v130_v33 = vld [vmem:[%s652_s3] sm:$0xff] }
  0x11   :  { %361 = vmatprep.subr.mxu0 %v456_v1  ;;  %386 = vmatprep.subr.mxu1 %v456_v1  ;;  %v307_v34 = vld [vmem:[%s651_s2] ss:$0 sm:$0xff] }
  0x12   :  { %362 = vmatpush3.msra.mxu0 %v38_v9  ;;  %387 = vmatpush3.msra.mxu1 %v142_v21  ;;  %v230_v47 = vld [vmem:[#allocation2] sm:$0x1] }
  0x13   :  { %363 = vmatprep.subr.mxu0 %v456_v1  ;;  %388 = vmatprep.subr.mxu1 %v456_v1  ;;  %v309_v2 = vld [vmem:[%s653_s4] ss:$0 sm:$0xff] }
  0x14   :  { %364 = vmatpush3.msra.mxu0 %v37_v10  ;;  %389 = vmatpush3.msra.mxu1 %v141_v22 }
  0x15   :  { %365 = vmatprep.subr.mxu0 %v456_v1  ;;  %390 = vmatprep.subr.mxu1 %v456_v1 }
  0x16   :  { %366 = vmatpush3.msra.mxu0 %v36_v11  ;;  %391 = vmatpush3.msra.mxu1 %v140_v23 }
  0x17   :  { %367 = vmatprep.subr.mxu0 %v456_v1  ;;  %392 = vmatprep.subr.mxu1 %v456_v1 }
  0x18   :  { %368 = vmatpush3.msra.mxu0 %v35_v12  ;;  %393 = vmatpush3.msra.mxu1 %v139_v24 }
  0x19   :  { %369 = vmatprep.subr.mxu0 %v456_v1  ;;  %394 = vmatprep.subr.mxu1 %v456_v1 }
  0x1a   :  { %370 = vmatpush3.msra.mxu0 %v34_v13  ;;  %395 = vmatpush3.msra.mxu1 %v138_v25 }
  0x1b   :  { %371 = vmatprep.subr.mxu0 %v456_v1  ;;  %396 = vmatprep.subr.mxu1 %v456_v1 }
  0x1c   :  { %372 = vmatpush3.msra.mxu0 %v33_v14  ;;  %397 = vmatpush3.msra.mxu1 %v137_v26 }
  0x1d   :  { %373 = vmatprep.subr.mxu0 %v456_v1  ;;  %398 = vmatprep.subr.mxu1 %v456_v1 }
  0x1e   :  { %374 = vmatpush3.msra.mxu0 %v32_v15  ;;  %399 = vmatpush3.msra.mxu1 %v136_v27 }
  0x1f   :  { %375 = vmatprep.subr.mxu0 %v456_v1  ;;  %400 = vmatprep.subr.mxu1 %v456_v1 }
  0x20   :  { %376 = vmatpush3.msra.mxu0 %v31_v16  ;;  %401 = vmatpush3.msra.mxu1 %v135_v28 }
  0x21   :  { %378 = vmatmul.mubr.f32.vlgmr.msra.gmra.mxu0 %v30_v17  ;;  %402 = vmatprep.subr.mxu1 %v456_v1 }
  0x22   :  { %403 = vmatpush3.msra.mxu1 %v134_v29 }
  0x23   :  { %404 = vmatprep.subr.mxu1 %v456_v1 }
  0x24   :  { %405 = vmatpush3.msra.mxu1 %v133_v30 }
  0x25   :  { %406 = vmatprep.subr.mxu1 %v456_v1 }
  0x26   :  { %407 = vmatpush3.msra.mxu1 %v132_v31 }
  0x27   :  { %408 = vmatprep.subr.mxu1 %v456_v1 }
  0x28   :  { %409 = vmatpush3.msra.mxu1 %v131_v32 }
  0x29   :  { %410 = vmatprep.subr.mxu1 %v456_v1 }
  0x2a   :  { %411 = vmatpush3.msra.mxu1 %v130_v33 }
  0xe1   :  { %v120_v35 = vpop.f32.mrf.mxu0 }
  0xe2   :  { %v121_v36 = vadd.f32 %v307_v34, %v120_v35 }
  0xe3   :  { %v379_v37 = vpop.f32.mrf.mxu0 }
  0xe4   :  { %v308_v38 = vmul.f32 -1.442695, %v121_v36 }
  0xe6   :  { %418 = vpow2.f32 %v308_v38 }
  0xf3   :  { %v419_v39 = vpop.eup %418 }
  0xf4   :  { %v127_v40 = vadd.f32 1.0, %v419_v39 }
  0xf6   :  { %420 = vrcp.f32 %v127_v40 }
 0x103   :  { %v421_v41 = vpop.eup %420 }
 0x104   :  { %v231_v42 = vrot.slane %v421_v41, 4  ;;  %413 = vmatmul.mubr.f32.vlgmr.msra.gmra.mxu1 %v421_v41 }
 0x106   :  { %v232_v43 = vadd.f32 %v421_v41, %v231_v42 }
 0x108   :  { %v233_v44 = vrot.slane %v232_v43, 2 }
 0x10a   :  { %v234_v45 = vadd.f32 %v233_v44, %v232_v43 }
 0x10c   :  { %v235_v46 = vrot.slane %v234_v45, 1 }
 0x10e   :  { %v236_v48 = vadd.f32 %v235_v46, %v234_v45 }
 0x110   :  { %v237_v49 = vadd.f32 %v236_v48, %v230_v47 }
 0x112   :  { %238 = vst [vmem:[#allocation2] sm:$0x1] %v237_v49 }
 0x119   :  { %v251_v50 = vld [vmem:[#allocation2] sm:$0x1] }
 0x11a   :  { %v252_v51 = vmul.f32 0.125, %v251_v50 }
 0x11c   :  { %v253_v52 = vmax.f32 %v252_v51, 1e-07 }
 0x11e   :  { %v254_v53 = vmin.f32 %v253_v52, 0.9999999 }
 0x120   :  { %422 = vlog2.f32 %v254_v53  ;;  %v259_v54 = vsub.f32 1.0, %v254_v53 }
 0x122   :  { %424 = vlog2.f32 %v259_v54 }
 0x12d   :  { %v423_v56 = vpop.eup %422 }
 0x12e   :  { %v256_v57 = vmul.f32 0.6931472, %v423_v56 }
 0x12f   :  { %v425_v58 = vpop.eup %424 }
 0x130   :  { %v257_v60 = vmul.f32 0.05, %v256_v57  ;;  %v261_v61 = vmul.f32 0.6931472, %v425_v58 }
 0x132   :  { %v258_v62 = vsub.f32 -0.19851524, %v257_v60  ;;  %v262_v63 = vmul.f32 0.95, %v261_v61 }
 0x134   :  { %v263_v0 = vsub.f32 %v258_v62, %v262_v63 }
 0x136   :  { %v267_v1 = vsel %vm266_vm1, %v263_v0, 0.0 }
 0x137   :  { %268 = vst [vmem:[%s655_s6] sm:$0x1] %v267_v1 }
 0x1c4   :  { %v219_v3 = vpop.f32.mrf.mxu1 }
 0x1c5   :  { %v220_v4 = vadd.f32 %v309_v2, %v219_v3 }
 0x1c6   :  { %v414_v5 = vpop.f32.mrf.mxu1 }
 0x1c7   :  { %v310_v6 = vmul.f32 -1.442695, %v220_v4 }
 0x1c9   :  { %426 = vpow2.f32 %v310_v6 }
 0x1d6   :  { %v427_v7 = vpop.eup %426 }
 0x1d7   :  { %v226_v8 = vadd.f32 1.0, %v427_v7 }
 0x1d9   :  { %428 = vrcp.f32 %v226_v8 }
 0x1e6   :  { %v429_v9 = vpop.eup %428 }
 0x1e7   :  { %v240_v10 = vrot.slane %v429_v9, 4  ;;  %229 = vst [vmem:[#allocation4] sm:$0xff] %v429_v9 }
 0x1e8   :  { %445 = shalt.err (!%p442_p4)
}
 0x1e9   :  { %294 = dma.vmem_to_hbm [thread:$0]  %s292_s22, 128, %s654_s5, [#allocation5]   ;;  %v241_v11 = vadd.f32 %v429_v9, %v240_v10  ;;  %v239_v15 = vld [vmem:[#allocation3] sm:$0x1]  ;;  %vm282_vm2 = vcmp.lt.s32.totalorder %v265_v59, 16 }
 0x1eb   :  { %v242_v12 = vrot.slane %v241_v11, 2 }
 0x1ed   :  { %v243_v13 = vadd.f32 %v242_v12, %v241_v11 }
 0x1ef   :  { %v244_v14 = vrot.slane %v243_v13, 1 }
 0x1f1   :  { %v245_v16 = vadd.f32 %v244_v14, %v243_v13 }
 0x1f3   :  { %v246_v17 = vadd.f32 %v245_v16, %v239_v15 }
 0x1f5   :  { %247 = vst [vmem:[#allocation3] sm:$0x1] %v246_v17 }
 0x1fc   :  { %v269_v18 = vld [vmem:[#allocation3] sm:$0x1] }
 0x1fd   :  { %v270_v19 = vmul.f32 0.125, %v269_v18 }
 0x1ff   :  { %v271_v20 = vmax.f32 %v270_v19, 1e-07 }
 0x201   :  { %v272_v21 = vmin.f32 %v271_v20, 0.9999999 }
 0x203   :  { %430 = vlog2.f32 %v272_v21  ;;  %v277_v22 = vsub.f32 1.0, %v272_v21 }
 0x205   :  { %432 = vlog2.f32 %v277_v22 }
 0x210   :  { %v431_v23 = vpop.eup %430 }
 0x211   :  { %v274_v24 = vmul.f32 0.6931472, %v431_v23 }
 0x212   :  { %v433_v25 = vpop.eup %432 }
 0x213   :  { %v275_v26 = vmul.f32 0.05, %v274_v24  ;;  %v279_v27 = vmul.f32 0.6931472, %v433_v25 }
 0x215   :  { %v276_v28 = vsub.f32 -0.19851524, %v275_v26  ;;  %v280_v29 = vmul.f32 0.95, %v279_v27 }
 0x217   :  { %v281_v30 = vsub.f32 %v276_v28, %v280_v29 }
 0x219   :  { %v283_v31 = vsel %vm282_vm2, %v281_v30, 0.0 }
 0x21a   :  { %284 = vst [vmem:[%s656_s7] sm:$0x1] %v283_v31 }
 0x21b   :  { %454 = dma.done.wait [#allocation5], 128  }
 0x21c   :  { %455 = vsyncadd [#allocation5], 4294967168 }
 0x21d   :  { %306 = vsyncpa [#allocation5], 1 }

</bundles_post_ra>
